<compile_context>
chip_gen: v7x
topology: tpu7x:2x2x1
jax: 0.10.0
libtpu: 0.0.40
codegen_flags: <defaults>
</compile_context>

<pallas_src>
import functools

import numpy as np
import jax
import jax.numpy as jnp
from jax.experimental import pallas as pl
from jax.experimental.pallas import tpu as pltpu


_DIAG_LANES = 128          # compact diagonal slab width (requires n <= 128)
_VAR_EPS = 1e-12           # guard for the one-pass variance formula


def _round_up(x, m):
    return ((x + m - 1) // m) * m


# ---------------------------------------------------------------------------
# Layout / tiling decisions (all static Python)
# ---------------------------------------------------------------------------
def _layout(N, h, n):
    """Lane-dense packing: k matrices per logical row of W (128-mult) lanes."""
    B, nn = N * h, n * n
    k = 1
    if 128 % n == 0:
        kc = 128 // n
        # pack only when it divides the batch and leaves >= 8 logical rows
        if kc > 1 and B % kc == 0 and B // kc >= 8:
            k = kc
    W = _round_up(k * nn, 128)
    Bl = B // k
    return B, nn, k, W, Bl


def _hw_config(W):
    """Generation-aware tile size + scoped-VMEM limit."""
    try:
        vmem_phys = int(pltpu.get_tpu_info().vmem_capacity_bytes)
    except Exception:          # be conservative if the query is unavailable
        vmem_phys = 64 * 1024 * 1024
    if vmem_phys >= 100 * 1024 * 1024:     # v5e / v6e: 128 MiB VMEM
        tile_bytes, vmem_limit = 8 << 20, 96 << 20
    else:                                  # v7x: 64 MiB VMEM
        tile_bytes, vmem_limit = 4 << 20, 40 << 20
    max_rows = max(8, tile_bytes // (W * 4))
    return max_rows, vmem_limit


def _tiling(Bl, max_rows):
    """Pick TB dividing Bl whenever possible -> no row pad / output slice."""
    if Bl < 8:
        return 8, 8                              # tiny batch: pad up to 8 rows
    if Bl <= max_rows:
        return Bl, Bl                            # single full-extent tile
    tb = (max_rows // 8) * 8
    while tb >= 8:                               # largest 8-mult divisor of Bl
        if Bl % tb == 0:
            return tb, Bl
        tb -= 8
    tb = (max_rows // 8) * 8                     # fallback: pad rows
    return tb, _round_up(Bl, tb)


# ---------------------------------------------------------------------------
# Small constant operands (built once, kept VMEM-resident across the grid)
# ---------------------------------------------------------------------------
def _build_constants(n, k, W):
    nn = n * n
    idx = np.arange(nn)
    strict = ((idx // n) > (idx % n)).astype(np.float32)     # strictly-lower

    mask = np.zeros((1, W), np.float32)
    mask[0, : k * nn] = np.tile(strict, k)

    gather = np.zeros((W, _DIAG_LANES), np.float32)          # row -> diag slab
    scatter = np.zeros((_DIAG_LANES, W), np.float32)         # diag slab -> row
    for j in range(k):
        for i in range(n):
            gather[j * nn + i * (n + 1), j * n + i] = 1.0
            scatter[j * n + i, j * nn + i * (n + 1)] = 1.0

    fill = np.zeros((1, _DIAG_LANES), np.float32)            # 1.0 on unused lanes
    fill[0, k * n:] = 1.0                                    # -> log(1) = 0

    return (jnp.asarray(mask), jnp.asarray(gather),
            jnp.asarray(scatter), jnp.asarray(fill))


def _identity_row(n, k, W):
    """Flattened identity matrices: a padding row that adds 0 to every stat."""
    nn = n * n
    row = np.zeros((W,), np.float32)
    row[: k * nn] = np.tile(np.eye(n, dtype=np.float32).reshape(nn), k)
    return jnp.asarray(row)


def _to_rows(x, nn, k, W, Bl, Blp):
    N, h, n, _ = x.shape
    xb = x.reshape(N * h, nn).astype(jnp.float32)
    if W == k * nn:
        xr = xb.reshape(Bl, W)                   # contiguous merge: free
    else:                                        # k == 1, n*n not 128-multiple
        xr = jnp.pad(xb, ((0, 0), (0, W - nn)))
    if Blp != Bl:                                # rare row-padding fallback
        pad = jnp.broadcast_to(_identity_row(n, k, W), (Blp - Bl, W))
        xr = jnp.concatenate([xr, pad], axis=0)
    return xr


def _tile_means(ms_pos, ml_pos, k, W):
    nn = ms_pos.shape[0]
    n = ml_pos.shape[0]
    ms_t = jnp.zeros((1, W), jnp.float32).at[0, : k * nn].set(jnp.tile(ms_pos, k))
    ml_t = jnp.zeros((1, _DIAG_LANES), jnp.float32).at[0, : k * n].set(
        jnp.tile(ml_pos, k))
    return ms_t, ml_t


# ---------------------------------------------------------------------------
# Pallas kernels
# ---------------------------------------------------------------------------
def _stats_kernel(TB, R, W, x_ref, msk_ref, g_ref, fill_ref,
                  sum_s_ref, ss_s_ref, sum_l_ref, ss_l_ref,
                  acc_s, acc_ss, acc_l, acc_ll):
    """Accumulate per-lane sums / sums-of-squares of log-Cholesky coordinates."""
    i = pl.program_id(1)

    @pl.when(i == 0)
    def _init():
        acc_s[...] = jnp.zeros_like(acc_s)
        acc_ss[...] = jnp.zeros_like(acc_ss)
        acc_l[...] = jnp.zeros_like(acc_l)
        acc_ll[...] = jnp.zeros_like(acc_ll)

    x = x_ref[...]                                            # (TB, W)
    xs = x * msk_ref[...]                                     # strict-lower part
    # Gather the k diagonals of each row into a 128-lane slab on the idle MXU.
    # Unused lanes become exactly 1.0 (log -> 0); a genuinely non-positive
    # diagonal still produces NaN, matching the reference behavior.
    d = jnp.dot(x, g_ref[...], preferred_element_type=jnp.float32) + fill_ref[...]
    logd = jnp.log(d)                                         # (TB, 128)

    if R > 1:   # per-sublane partials: no cross-sublane reduce in the hot loop
        acc_s[...] += jnp.sum(xs.reshape(TB // R, R, W), axis=0)
        acc_ss[...] += jnp.sum((xs * xs).reshape(TB // R, R, W), axis=0)
        acc_l[...] += jnp.sum(logd.reshape(TB // R, R, _DIAG_LANES), axis=0)
        acc_ll[...] += jnp.sum((logd * logd).reshape(TB // R, R, _DIAG_LANES),
                               axis=0)
    else:
        acc_s[...] += jnp.sum(xs, axis=0, keepdims=True)
        acc_ss[...] += jnp.sum(xs * xs, axis=0, keepdims=True)
        acc_l[...] += jnp.sum(logd, axis=0, keepdims=True)
        acc_ll[...] += jnp.sum(logd * logd, axis=0, keepdims=True)

    @pl.when(i == pl.num_programs(1) - 1)
    def _finalize():                      # one 8 -> 1 sublane reduce per core
        sum_s_ref[...] = jnp.sum(acc_s[...], axis=0, keepdims=True)
        ss_s_ref[...] = jnp.sum(acc_ss[...], axis=0, keepdims=True)
        sum_l_ref[...] = jnp.sum(acc_l[...], axis=0, keepdims=True)
        ss_l_ref[...] = jnp.sum(acc_ll[...], axis=0, keepdims=True)


def _normalize_kernel(f_ref, x_ref, msk_ref, g_ref, sc_ref, fill_ref,
                      ms_ref, ml_ref, y_ref):
    """Center + scale in log-Cholesky coordinates (train and eval path)."""
    f = f_ref[0, 0]
    x = x_ref[...]                                            # (TB, W)
    y_strict = (f * msk_ref[...]) * (x - ms_ref[...])
    d = jnp.dot(x, g_ref[...], preferred_element_type=jnp.float32) + fill_ref[...]
    yd = jnp.exp(f * (jnp.log(d) - ml_ref[...]))              # (TB, 128)
    y_ref[...] = y_strict + jnp.dot(yd, sc_ref[...],
                                    preferred_element_type=jnp.float32)


# ---------------------------------------------------------------------------
# pallas_call wrappers
# ---------------------------------------------------------------------------
def _stats_call(xr, consts, TB, R, W, Blp, C, vmem_limit):
    mask, gather, _, fill = consts
    G = Blp // TB
    Gc = G // C
    res = lambda shape: pl.BlockSpec(shape, lambda c, i: (0, 0))
    part = lambda shape: pl.BlockSpec(shape, lambda c, i: (c, 0))
    return pl.pallas_call(
        functools.partial(_stats_kernel, TB, R, W),
        grid=(C, Gc),
        in_specs=[
            pl.BlockSpec((TB, W), lambda c, i: (c * Gc + i, 0)),   # x tile
            res((1, W)),                                           # strict mask
            res((W, _DIAG_LANES)),                                 # diag gather
            res((1, _DIAG_LANES)),                                 # lane fill
        ],
        out_specs=(
            part((1, W)), part((1, W)),
            part((1, _DIAG_LANES)), part((1, _DIAG_LANES)),
        ),
        out_shape=(
            jax.ShapeDtypeStruct((C, W), jnp.float32),             # sum strict
            jax.ShapeDtypeStruct((C, W), jnp.float32),             # sumsq strict
            jax.ShapeDtypeStruct((C, _DIAG_LANES), jnp.float32),   # sum log-diag
            jax.ShapeDtypeStruct((C, _DIAG_LANES), jnp.float32),   # sumsq log-diag
        ),
        scratch_shapes=[
            pltpu.VMEM((R, W), jnp.float32),
            pltpu.VMEM((R, W), jnp.float32),
            pltpu.VMEM((R, _DIAG_LANES), jnp.float32),
            pltpu.VMEM((R, _DIAG_LANES), jnp.float32),
        ],
        compiler_params=pltpu.CompilerParams(
            dimension_semantics=("parallel", "arbitrary"),
            vmem_limit_bytes=vmem_limit),
        cost_estimate=pl.CostEstimate(
            flops=int(2 * Blp * W * _DIAG_LANES + 8 * Blp * W),
            transcendentals=int(Blp * _DIAG_LANES),
            bytes_accessed=int(Blp * W * 4)),
    )(xr, mask, gather, fill)


def _normalize_call(xr, factor, consts, ms_t, ml_t, TB, W, Blp, vmem_limit):
    mask, gather, scatter, fill = consts
    G = Blp // TB
    res = lambda shape: pl.BlockSpec(shape, lambda i: (0, 0))
    return pl.pallas_call(
        _normalize_kernel,
        grid=(G,),
        in_specs=[
            pl.BlockSpec(memory_space=pltpu.MemorySpace.SMEM),     # f = s/sqrt(var)
            pl.BlockSpec((TB, W), lambda i: (i, 0)),               # x tile
            res((1, W)),                                           # strict mask
            res((W, _DIAG_LANES)),                                 # diag gather
            res((_DIAG_LANES, W)),                                 # diag scatter
            res((1, _DIAG_LANES)),                                 # lane fill
            res((1, W)),                                           # strict mean
            res((1, _DIAG_LANES)),                                 # mean log-diag
        ],
        out_specs=pl.BlockSpec((TB, W), lambda i: (i, 0)),
        out_shape=jax.ShapeDtypeStruct((Blp, W), jnp.float32),
        compiler_params=pltpu.CompilerParams(
            dimension_semantics=("parallel",),
            vmem_limit_bytes=vmem_limit),
        cost_estimate=pl.CostEstimate(
            flops=int(4 * Blp * W * _DIAG_LANES + 8 * Blp * W),
            transcendentals=int(2 * Blp * _DIAG_LANES),
            bytes_accessed=int(2 * Blp * W * 4)),
    )(factor, xr, mask, gather, scatter, fill, ms_t, ml_t)


def _unpack_rows(y, N, h, n, nn, k, W, Bl):
    y = y[:Bl]                                   # no-op in the common case
    if W != k * nn:
        y = y[:, : k * nn]
    return y.reshape(N * h, nn).reshape(N, h, n, n)


# ---------------------------------------------------------------------------
# Module forward (train / eval) + running-stat update
# ---------------------------------------------------------------------------
def cholesky_batchnorm_spd_train(x, s):
    """x: (N, h, n, n) Cholesky factors.  Returns (y, batch_mean, batch_var)."""
    N, h, n, _ = x.shape
    assert n <= _DIAG_LANES, "diagonal slab requires n <= 128"
    B, nn, k, W, Bl = _layout(N, h, n)
    max_rows, vmem_limit = _hw_config(W)
    TB, Blp = _tiling(Bl, max_rows)
    R = 8 if TB % 8 == 0 else 1
    G = Blp // TB
    C = 2 if (G >= 2 and G % 2 == 0) else 1      # megacore split of stats pass

    consts = _build_constants(n, k, W)
    xr = _to_rows(x, nn, k, W, Bl, Blp)

    sum_s, ss_s, sum_l, ss_l = _stats_call(xr, consts, TB, R, W, Blp, C,
                                           vmem_limit)

    # Combine per-core partials and fold the k packed slots (tiny XLA ops).
    inv_b = 1.0 / B
    ms_pos = jnp.sum(sum_s, axis=0)[: k * nn].reshape(k, nn).sum(0) * inv_b
    ml_pos = jnp.sum(sum_l, axis=0)[: k * n].reshape(k, n).sum(0) * inv_b
    var = ((jnp.sum(ss_s) + jnp.sum(ss_l)) * inv_b
           - jnp.sum(ms_pos * ms_pos) - jnp.sum(ml_pos * ml_pos))
    batch_var = jnp.maximum(var, _VAR_EPS)       # one-pass formula can dip < 0
    batch_mean = ms_pos.reshape(n, n) + jnp.diag(jnp.exp(ml_pos))

    factor = (jnp.asarray(s, jnp.float32) / jnp.sqrt(batch_var)).reshape(1, 1)
    ms_t, ml_t = _tile_means(ms_pos, ml_pos, k, W)

    y = _normalize_call(xr, factor, consts, ms_t, ml_t, TB, W, Blp, vmem_limit)
    return _unpack_rows(y, N, h, n, nn, k, W, Bl), batch_mean, batch_var


def cholesky_batchnorm_spd_eval(x, s, running_mean, running_var):
    N, h, n, _ = x.shape
    assert n <= _DIAG_LANES, "diagonal slab requires n <= 128"
    B, nn, k, W, Bl = _layout(N, h, n)
    max_rows, vmem_limit = _hw_config(W)
    TB, Blp = _tiling(Bl, max_rows)

    consts = _build_constants(n, k, W)
    xr = _to_rows(x, nn, k, W, Bl, Blp)

    rm = jnp.asarray(running_mean, jnp.float32)
    ms_pos = jnp.tril(rm, -1).reshape(nn)
    ml_pos = jnp.log(jnp.diagonal(rm))
    ms_t, ml_t = _tile_means(ms_pos, ml_pos, k, W)
    factor = (jnp.asarray(s, jnp.float32)
              / jnp.sqrt(jnp.asarray(running_var, jnp.float32))).reshape(1, 1)

    y = _normalize_call(xr, factor, consts, ms_t, ml_t, TB, W, Blp, vmem_limit)
    return _unpack_rows(y, N, h, n, nn, k, W, Bl)


def update_running_stats(running_mean, running_var, batch_mean, batch_var,
                         momentum=0.9):
    """Geodesic interpolation of the running statistics (no_grad side effect)."""
    t = momentum
    strict = t * jnp.tril(running_mean, -1) + (1.0 - t) * jnp.tril(batch_mean, -1)
    diag = (jnp.diagonal(running_mean) ** t) * (jnp.diagonal(batch_mean) ** (1.0 - t))
    new_mean = strict + jnp.diag(diag)
    new_var = (running_var ** t) * (batch_var ** (1.0 - t))
    return new_mean, new_var


# ---------------------------------------------------------------------------
# Pure-JAX references (correctness sanity checks)
# ---------------------------------------------------------------------------
def _ref_normalize(xb, mean, var, s):
    n = mean.shape[0]
    strict = jnp.tril(xb, -1)
    logd = jnp.log(jnp.diagonal(xb, axis1=-2, axis2=-1))
    ms = jnp.tril(mean, -1)
    ml = jnp.log(jnp.diagonal(mean))
    f = s / jnp.sqrt(var)
    return f * (strict - ms) + jnp.exp(f * (logd - ml))[..., :, None] * jnp.eye(n)


def _ref_train(x, s):
    N, h, n, _ = x.shape
    xb = x.reshape(N * h, n, n).astype(jnp.float32)
    strict = jnp.tril(xb, -1)
    logd = jnp.log(jnp.diagonal(xb, axis1=-2, axis2=-1))
    ms, ml = strict.mean(0), logd.mean(0)
    var = ((strict - ms) ** 2).sum() / (N * h) + ((logd - ml) ** 2).sum() / (N * h)
    mean = jnp.tril(ms, -1) + jnp.diag(jnp.exp(ml))
    y = _ref_normalize(xb, mean, var, s)
    return y.reshape(N, h, n, n), mean, var


# ---------------------------------------------------------------------------
if __name__ == "__main__":
    key = jax.random.PRNGKey(0)
    N, h, n = 2, 4, 16

    k1, k2 = jax.random.split(key)
    low = 0.1 * jnp.tril(jax.random.normal(k1, (N, h, n, n), jnp.float32), -1)
    diag = jnp.exp(0.2 * jax.random.normal(k2, (N, h, n), jnp.float32))
    X = low + diag[..., :, None] * jnp.eye(n, dtype=jnp.float32)   # Cholesky factors

    # Module parameters / buffers (deterministic, as in __init__).
    s = jnp.float32(1.0)
    running_mean = jnp.eye(n, dtype=jnp.float32)
    running_var = jnp.float32(1.0)

    # Training-mode forward (default nn.Module mode) + running-stat update.
    y, batch_mean, batch_var = cholesky_batchnorm_spd_train(X, s)
    running_mean, running_var = update_running_stats(
        running_mean, running_var, batch_mean, batch_var, momentum=0.9)

    # Eval-mode forward with the updated running statistics.
    y_eval = cholesky_batchnorm_spd_eval(X, s, running_mean, running_var)

    jax.block_until_ready((y, y_eval, batch_mean, batch_var))

    # Sanity checks against pure-JAX references of the same math.
    y_ref, mean_ref, var_ref = _ref_train(X, s)
    assert jnp.allclose(y, y_ref, atol=1e-5, rtol=1e-5)
    assert jnp.allclose(batch_mean, mean_ref, atol=1e-5, rtol=1e-5)
    assert jnp.allclose(batch_var, var_ref, atol=1e-5, rtol=1e-5)

    y_eval_ref = _ref_normalize(X.reshape(N * h, n, n), running_mean,
                                running_var, s).reshape(N, h, n, n)
    assert jnp.allclose(y_eval, y_eval_ref, atol=1e-5, rtol=1e-5)

    print("KERNEL_OK")
</pallas_src>

<mosaic_0001>
module attributes {stable_mosaic.version = 11 : i64} {
  func.func @_stats_kernel(%arg0: i32, %arg1: i32, %arg2: memref<8x256xf32, #tpu.memory_space<vmem>>, %arg3: memref<1x256xf32, #tpu.memory_space<vmem>>, %arg4: memref<256x128xf32, #tpu.memory_space<vmem>>, %arg5: memref<1x128xf32, #tpu.memory_space<vmem>>, %arg6: memref<1x256xf32, #tpu.memory_space<vmem>>, %arg7: memref<1x256xf32, #tpu.memory_space<vmem>>, %arg8: memref<1x128xf32, #tpu.memory_space<vmem>>, %arg9: memref<1x128xf32, #tpu.memory_space<vmem>>, %arg10: memref<8x256xf32, #tpu.memory_space<vmem>>, %arg11: memref<8x256xf32, #tpu.memory_space<vmem>>, %arg12: memref<8x128xf32, #tpu.memory_space<vmem>>, %arg13: memref<8x128xf32, #tpu.memory_space<vmem>>) attributes {dimension_semantics = [#tpu.dimension_semantics<parallel>, #tpu.dimension_semantics<arbitrary>], iteration_bounds = array<i64: 1, 1>, scalar_prefetch = 0 : i64, scratch_operands = 4 : i64, tpu.core_type = #tpu.core_type<tc>, window_params = [{transform_indices = @transform_0, window_bounds = array<i64: 8, 256>}, {pipeline_mode = #tpu.pipeline_mode<synchronous>, transform_indices = @transform_1, window_bounds = array<i64: 1, 256>}, {pipeline_mode = #tpu.pipeline_mode<synchronous>, transform_indices = @transform_2, window_bounds = array<i64: 256, 128>}, {pipeline_mode = #tpu.pipeline_mode<synchronous>, transform_indices = @transform_3, window_bounds = array<i64: 1, 128>}, {transform_indices = @transform_4, window_bounds = array<i64: 1, 256>}, {transform_indices = @transform_5, window_bounds = array<i64: 1, 256>}, {transform_indices = @transform_6, window_bounds = array<i64: 1, 128>}, {transform_indices = @transform_7, window_bounds = array<i64: 1, 128>}]} {
    %c0_i32 = arith.constant 0 : i32
    %0 = arith.cmpi eq, %arg1, %c0_i32 : i32
    %1 = arith.extui %0 : i1 to i32
    %c0_i32_0 = arith.constant 0 : i32
    %2 = arith.cmpi ne, %1, %c0_i32_0 : i32
    scf.if %2 {
      %cst_30 = arith.constant 0.000000e+00 : f32
      %38 = vector.broadcast %cst_30 : f32 to vector<8x256xf32>
      %c0_31 = arith.constant 0 : index
      %c0_32 = arith.constant 0 : index
      %39 = vector.load %arg10[%c0_31, %c0_32] : memref<8x256xf32, #tpu.memory_space<vmem>>, vector<8x256xf32>
      tpu.vector_store %arg10[%c0_31, %c0_32], %38 {strides = array<i32>} : memref<8x256xf32, #tpu.memory_space<vmem>>, vector<8x256xf32>,
      %cst_33 = arith.constant 0.000000e+00 : f32
      %40 = vector.broadcast %cst_33 : f32 to vector<8x256xf32>
      %c0_34 = arith.constant 0 : index
      %c0_35 = arith.constant 0 : index
      %41 = vector.load %arg11[%c0_34, %c0_35] : memref<8x256xf32, #tpu.memory_space<vmem>>, vector<8x256xf32>
      tpu.vector_store %arg11[%c0_34, %c0_35], %40 {strides = array<i32>} : memref<8x256xf32, #tpu.memory_space<vmem>>, vector<8x256xf32>,
      %cst_36 = arith.constant 0.000000e+00 : f32
      %42 = vector.broadcast %cst_36 : f32 to vector<8x128xf32>
      %c0_37 = arith.constant 0 : index
      %c0_38 = arith.constant 0 : index
      %43 = vector.load %arg12[%c0_37, %c0_38] : memref<8x128xf32, #tpu.memory_space<vmem>>, vector<8x128xf32>
      tpu.vector_store %arg12[%c0_37, %c0_38], %42 {strides = array<i32>} : memref<8x128xf32, #tpu.memory_space<vmem>>, vector<8x128xf32>,
      %cst_39 = arith.constant 0.000000e+00 : f32
      %44 = vector.broadcast %cst_39 : f32 to vector<8x128xf32>
      %c0_40 = arith.constant 0 : index
      %c0_41 = arith.constant 0 : index
      %45 = vector.load %arg13[%c0_40, %c0_41] : memref<8x128xf32, #tpu.memory_space<vmem>>, vector<8x128xf32>
      tpu.vector_store %arg13[%c0_40, %c0_41], %44 {strides = array<i32>} : memref<8x128xf32, #tpu.memory_space<vmem>>, vector<8x128xf32>,
    } else {
    }
    %c0 = arith.constant 0 : index
    %c0_1 = arith.constant 0 : index
    %3 = vector.load %arg2[%c0, %c0_1] : memref<8x256xf32, #tpu.memory_space<vmem>>, vector<8x256xf32>
    %c0_2 = arith.constant 0 : index
    %c0_3 = arith.constant 0 : index
    %4 = vector.load %arg3[%c0_2, %c0_3] : memref<1x256xf32, #tpu.memory_space<vmem>>, vector<1x256xf32>
    %5 = vector.broadcast %4 : vector<1x256xf32> to vector<8x256xf32>
    %6 = arith.mulf %3, %5 : vector<8x256xf32>
    %c0_4 = arith.constant 0 : index
    %c0_5 = arith.constant 0 : index
    %7 = vector.load %arg4[%c0_4, %c0_5] : memref<256x128xf32, #tpu.memory_space<vmem>>, vector<256x128xf32>
    %cst = arith.constant dense<0.000000e+00> : vector<8x128xf32>
    %8 = tpu.matmul %3, %7, %cst {dimension_numbers = #tpu.dot_dimension_numbers<[1], [0], [0], [1], [0, 0, 1, 1], [], []>} : vector<8x256xf32>, vector<256x128xf32>, vector<8x128xf32> -> vector<8x128xf32>
    %c0_6 = arith.constant 0 : index
    %c0_7 = arith.constant 0 : index
    %9 = vector.load %arg5[%c0_6, %c0_7] : memref<1x128xf32, #tpu.memory_space<vmem>>, vector<1x128xf32>
    %10 = vector.broadcast %9 : vector<1x128xf32> to vector<8x128xf32>
    %11 = arith.addf %8, %10 : vector<8x128xf32>
    %12 = math.log %11 : vector<8x128xf32>
    %c0_8 = arith.constant 0 : index
    %c0_9 = arith.constant 0 : index
    %13 = vector.load %arg10[%c0_8, %c0_9] : memref<8x256xf32, #tpu.memory_space<vmem>>, vector<8x256xf32>
    %14 = vector.shape_cast %6 : vector<8x256xf32> to vector<1x8x256xf32>
    %cst_10 = arith.constant dense<0.000000e+00> : vector<8x256xf32>
    %15 = vector.multi_reduction <add>, %14, %cst_10 [0] : vector<1x8x256xf32> to vector<8x256xf32>
    %16 = arith.addf %13, %15 : vector<8x256xf32>
    %c0_11 = arith.constant 0 : index
    %c0_12 = arith.constant 0 : index
    %17 = vector.load %arg10[%c0_11, %c0_12] : memref<8x256xf32, #tpu.memory_space<vmem>>, vector<8x256xf32>
    tpu.vector_store %arg10[%c0_11, %c0_12], %16 {strides = array<i32>} : memref<8x256xf32, #tpu.memory_space<vmem>>, vector<8x256xf32>,
    %c0_13 = arith.constant 0 : index
    %c0_14 = arith.constant 0 : index
    %18 = vector.load %arg11[%c0_13, %c0_14] : memref<8x256xf32, #tpu.memory_space<vmem>>, vector<8x256xf32>
    %19 = arith.mulf %6, %6 : vector<8x256xf32>
    %20 = vector.shape_cast %19 : vector<8x256xf32> to vector<1x8x256xf32>
    %cst_15 = arith.constant dense<0.000000e+00> : vector<8x256xf32>
    %21 = vector.multi_reduction <add>, %20, %cst_15 [0] : vector<1x8x256xf32> to vector<8x256xf32>
    %22 = arith.addf %18, %21 : vector<8x256xf32>
    %c0_16 = arith.constant 0 : index
    %c0_17 = arith.constant 0 : index
    %23 = vector.load %arg11[%c0_16, %c0_17] : memref<8x256xf32, #tpu.memory_space<vmem>>, vector<8x256xf32>
    tpu.vector_store %arg11[%c0_16, %c0_17], %22 {strides = array<i32>} : memref<8x256xf32, #tpu.memory_space<vmem>>, vector<8x256xf32>,
    %c0_18 = arith.constant 0 : index
    %c0_19 = arith.constant 0 : index
    %24 = vector.load %arg12[%c0_18, %c0_19] : memref<8x128xf32, #tpu.memory_space<vmem>>, vector<8x128xf32>
    %25 = vector.shape_cast %12 : vector<8x128xf32> to vector<1x8x128xf32>
    %cst_20 = arith.constant dense<0.000000e+00> : vector<8x128xf32>
    %26 = vector.multi_reduction <add>, %25, %cst_20 [0] : vector<1x8x128xf32> to vector<8x128xf32>
    %27 = arith.addf %24, %26 : vector<8x128xf32>
    %c0_21 = arith.constant 0 : index
    %c0_22 = arith.constant 0 : index
    %28 = vector.load %arg12[%c0_21, %c0_22] : memref<8x128xf32, #tpu.memory_space<vmem>>, vector<8x128xf32>
    tpu.vector_store %arg12[%c0_21, %c0_22], %27 {strides = array<i32>} : memref<8x128xf32, #tpu.memory_space<vmem>>, vector<8x128xf32>,
    %c0_23 = arith.constant 0 : index
    %c0_24 = arith.constant 0 : index
    %29 = vector.load %arg13[%c0_23, %c0_24] : memref<8x128xf32, #tpu.memory_space<vmem>>, vector<8x128xf32>
    %30 = arith.mulf %12, %12 : vector<8x128xf32>
    %31 = vector.shape_cast %30 : vector<8x128xf32> to vector<1x8x128xf32>
    %cst_25 = arith.constant dense<0.000000e+00> : vector<8x128xf32>
    %32 = vector.multi_reduction <add>, %31, %cst_25 [0] : vector<1x8x128xf32> to vector<8x128xf32>
    %33 = arith.addf %29, %32 : vector<8x128xf32>
    %c0_26 = arith.constant 0 : index
    %c0_27 = arith.constant 0 : index
    %34 = vector.load %arg13[%c0_26, %c0_27] : memref<8x128xf32, #tpu.memory_space<vmem>>, vector<8x128xf32>
    tpu.vector_store %arg13[%c0_26, %c0_27], %33 {strides = array<i32>} : memref<8x128xf32, #tpu.memory_space<vmem>>, vector<8x128xf32>,
    %c0_i32_28 = arith.constant 0 : i32
    %35 = arith.cmpi eq, %arg1, %c0_i32_28 : i32
    %36 = arith.extui %35 : i1 to i32
    %c0_i32_29 = arith.constant 0 : i32
    %37 = arith.cmpi ne, %36, %c0_i32_29 : i32
    scf.if %37 {
      %c0_30 = arith.constant 0 : index
      %c0_31 = arith.constant 0 : index
      %38 = vector.load %arg10[%c0_30, %c0_31] : memref<8x256xf32, #tpu.memory_space<vmem>>, vector<8x256xf32>
      %cst_32 = arith.constant dense<0.000000e+00> : vector<256xf32>
      %39 = vector.multi_reduction <add>, %38, %cst_32 [0] : vector<8x256xf32> to vector<256xf32>
      %40 = vector.shape_cast %39 : vector<256xf32> to vector<1x256xf32>
      %c0_33 = arith.constant 0 : index
      %c0_34 = arith.constant 0 : index
      %41 = vector.load %arg6[%c0_33, %c0_34] : memref<1x256xf32, #tpu.memory_space<vmem>>, vector<1x256xf32>
      tpu.vector_store %arg6[%c0_33, %c0_34], %40 {strides = array<i32>} : memref<1x256xf32, #tpu.memory_space<vmem>>, vector<1x256xf32>,
      %c0_35 = arith.constant 0 : index
      %c0_36 = arith.constant 0 : index
      %42 = vector.load %arg11[%c0_35, %c0_36] : memref<8x256xf32, #tpu.memory_space<vmem>>, vector<8x256xf32>
      %cst_37 = arith.constant dense<0.000000e+00> : vector<256xf32>
      %43 = vector.multi_reduction <add>, %42, %cst_37 [0] : vector<8x256xf32> to vector<256xf32>
      %44 = vector.shape_cast %43 : vector<256xf32> to vector<1x256xf32>
      %c0_38 = arith.constant 0 : index
      %c0_39 = arith.constant 0 : index
      %45 = vector.load %arg7[%c0_38, %c0_39] : memref<1x256xf32, #tpu.memory_space<vmem>>, vector<1x256xf32>
      tpu.vector_store %arg7[%c0_38, %c0_39], %44 {strides = array<i32>} : memref<1x256xf32, #tpu.memory_space<vmem>>, vector<1x256xf32>,
      %c0_40 = arith.constant 0 : index
      %c0_41 = arith.constant 0 : index
      %46 = vector.load %arg12[%c0_40, %c0_41] : memref<8x128xf32, #tpu.memory_space<vmem>>, vector<8x128xf32>
      %cst_42 = arith.constant dense<0.000000e+00> : vector<128xf32>
      %47 = vector.multi_reduction <add>, %46, %cst_42 [0] : vector<8x128xf32> to vector<128xf32>
      %48 = vector.shape_cast %47 : vector<128xf32> to vector<1x128xf32>
      %c0_43 = arith.constant 0 : index
      %c0_44 = arith.constant 0 : index
      %49 = vector.load %arg8[%c0_43, %c0_44] : memref<1x128xf32, #tpu.memory_space<vmem>>, vector<1x128xf32>
      tpu.vector_store %arg8[%c0_43, %c0_44], %48 {strides = array<i32>} : memref<1x128xf32, #tpu.memory_space<vmem>>, vector<1x128xf32>,
      %c0_45 = arith.constant 0 : index
      %c0_46 = arith.constant 0 : index
      %50 = vector.load %arg13[%c0_45, %c0_46] : memref<8x128xf32, #tpu.memory_space<vmem>>, vector<8x128xf32>
      %cst_47 = arith.constant dense<0.000000e+00> : vector<128xf32>
      %51 = vector.multi_reduction <add>, %50, %cst_47 [0] : vector<8x128xf32> to vector<128xf32>
      %52 = vector.shape_cast %51 : vector<128xf32> to vector<1x128xf32>
      %c0_48 = arith.constant 0 : index
      %c0_49 = arith.constant 0 : index
      %53 = vector.load %arg9[%c0_48, %c0_49] : memref<1x128xf32, #tpu.memory_space<vmem>>, vector<1x128xf32>
      tpu.vector_store %arg9[%c0_48, %c0_49], %52 {strides = array<i32>} : memref<1x128xf32, #tpu.memory_space<vmem>>, vector<1x128xf32>,
    } else {
    }
    return
  }
  func.func @transform_0(%arg0: i32, %arg1: i32) -> (i32, i32) {
    %c1_i32 = arith.constant 1 : i32
    %0 = arith.muli %arg0, %c1_i32 : i32
    %1 = arith.addi %0, %arg1 : i32
    %c0_i32 = arith.constant 0 : i32
    %c0_i32_0 = arith.constant 0 : i32
    return %1, %c0_i32 : i32, i32
  }
  func.func @transform_1(%arg0: i32, %arg1: i32) -> (i32, i32) {
    %c0_i32 = arith.constant 0 : i32
    %c0_i32_0 = arith.constant 0 : i32
    %c0_i32_1 = arith.constant 0 : i32
    return %c0_i32, %c0_i32_0 : i32, i32
  }
  func.func @transform_2(%arg0: i32, %arg1: i32) -> (i32, i32) {
    %c0_i32 = arith.constant 0 : i32
    %c0_i32_0 = arith.constant 0 : i32
    %c0_i32_1 = arith.constant 0 : i32
    return %c0_i32, %c0_i32_0 : i32, i32
  }
  func.func @transform_3(%arg0: i32, %arg1: i32) -> (i32, i32) {
    %c0_i32 = arith.constant 0 : i32
    %c0_i32_0 = arith.constant 0 : i32
    %c0_i32_1 = arith.constant 0 : i32
    return %c0_i32, %c0_i32_0 : i32, i32
  }
  func.func @transform_4(%arg0: i32, %arg1: i32) -> (i32, i32) {
    %c0_i32 = arith.constant 0 : i32
    %c0_i32_0 = arith.constant 0 : i32
    return %arg0, %c0_i32 : i32, i32
  }
  func.func @transform_5(%arg0: i32, %arg1: i32) -> (i32, i32) {
    %c0_i32 = arith.constant 0 : i32
    %c0_i32_0 = arith.constant 0 : i32
    return %arg0, %c0_i32 : i32, i32
  }
  func.func @transform_6(%arg0: i32, %arg1: i32) -> (i32, i32) {
    %c0_i32 = arith.constant 0 : i32
    %c0_i32_0 = arith.constant 0 : i32
    return %arg0, %c0_i32 : i32, i32
  }
  func.func @transform_7(%arg0: i32, %arg1: i32) -> (i32, i32) {
    %c0_i32 = arith.constant 0 : i32
    %c0_i32_0 = arith.constant 0 : i32
    return %arg0, %c0_i32 : i32, i32
  }
}

</mosaic_0001>

<bundles_post_ra>
// kernel: tpu_custom_call.1
= control target key start
LH: loop header
LB: loop body
LE: loop exit
PB: predicated region body
PF: predicated region fallthrough
CT: control target
= control target key end

     0   :  { %13 = vsyncpa [#allocation7], 0  ;;  %s728_s0 = inlined_call_operand.hbm [shape: f32[8,256], index: 0, kind: input, shape index: {}]   ;;  %s729_s1 = inlined_call_operand.vmem [shape: f32[1,256], index: 1, kind: input, shape index: {}]   ;;  %s730_s2 = inlined_call_operand.hbm [shape: f32[256,128], index: 2, kind: input, shape index: {}]   ;;  %s731_s3 = inlined_call_operand.vmem [shape: f32[1,128], index: 3, kind: input, shape index: {}]   ;;  %s732_s4 = inlined_call_operand.hbm [shape: f32[1,256], index: 4, kind: output, shape index: {0}]   ;;  %s733_s5 = inlined_call_operand.hbm [shape: f32[1,256], index: 5, kind: output, shape index: {1}]   ;;  %s734_s6 = inlined_call_operand.hbm [shape: f32[1,128], index: 6, kind: output, shape index: {2}]   ;;  %s735_s7 = inlined_call_operand.hbm [shape: f32[1,128], index: 7, kind: output, shape index: {3}]  }
   0x1   :  { %14 = vsyncpa [#allocation10], 0 }
   0x2   :  { %15 = vsyncpa [#allocation8], 0 }
   0x3   :  { %16 = vsyncpa [#allocation13], 0 }
   0x4   :  { %17 = vsyncpa [#allocation16], 0  ;;  %s586_s24 = smov [#allocation6]   ;;  %s587_s26 = smov [#allocation9]  }
   0x5   :  { %s28_s25 = sshll.u32 %s586_s24, 4  ;;  %s39_s27 = sshll.u32 %s587_s26, 4  ;;  %s29_s25 = int_to_ptr.vmem [resolvable:$true] %s28_s25  ;;  %s635_s27 = int_to_ptr.vmem [resolvable:$true] %s39_s27 }
   0x6   :  { %s444_s30 = scalar_lea.hbm %s728_s0, 256 }
   0x7   :  { %p445_p0 = scmp.ne.s32.totalorder %s728_s0, %s444_s30  ;;  %p448_p1 = scmp.lt.u32.totalorder %s444_s30, %s728_s0 }
   0x9   :  { %p450_p2 = pnand %p448_p1, %p445_p0 }
   0xb   :  { %453 = shalt.err (!%p450_p2)
}
   0xc   :  { %s454_s12 = scalar_lea.vmem %s29_s25, 256  ;;  %p459_p4 = scmp.lt.s32.totalorder %s29_s25, %s29_s25 }
   0xd   :  { %p455_p3 = scmp.ne.s32.totalorder %s29_s25, %s454_s12  ;;  %p460_p5 = scmp.lt.s32.totalorder %s454_s12, %s454_s12 }
   0xf   :  { %p461_p6 = por %p460_p5, %p459_p4 }
  0x11   :  { %p462_p7 = pnand %p461_p6, %p455_p3 }
  0x13   :  { %465 = shalt.err (!%p462_p7)
}
  0x14   :  { %31 = dma.hbm_to_vmem [thread:$0]  %s728_s0, 256, %s29_s25, [#allocation7]  }
  0x15   :  { %s466_s17 = scalar_lea.hbm %s730_s2, 4096 }
  0x16   :  { %p467_p8 = scmp.ne.s32.totalorder %s730_s2, %s466_s17  ;;  %p470_p9 = scmp.lt.u32.totalorder %s466_s17, %s730_s2 }
  0x18   :  { %p472_p10 = pnand %p470_p9, %p467_p8 }
  0x1a   :  { %475 = shalt.err (!%p472_p10)
}
  0x1b   :  { %s476_s22 = scalar_lea.vmem %s635_s27, 4096  ;;  %p481_p12 = scmp.lt.s32.totalorder %s635_s27, %s635_s27 }
  0x1c   :  { %p477_p11 = scmp.ne.s32.totalorder %s635_s27, %s476_s22  ;;  %p482_p13 = scmp.lt.s32.totalorder %s476_s22, %s476_s22 }
  0x1e   :  { %p483_p0 = por %p482_p13, %p481_p12 }
  0x20   :  { %p484_p1 = pnand %p483_p0, %p477_p11 }
  0x22   :  { %487 = shalt.err (!%p484_p1)
}
  0x23   :  { %s588_s0 = smov 128   ;;  %s589_s23 = smov 8  }
  0x24   :  { %45 = dma.hbm_to_vmem [thread:$0]  %s730_s2, 4096, %s635_s27, [#allocation10], %s588_s0, %s588_s0, %s589_s23  }
  0x25   :  { %576 = dma.done.wait [#allocation7], 256  }
  0x26   :  { %577 = vsyncadd [#allocation7], 4294967040 }
  0x27   :  { %578 = dma.done.wait [#allocation10], 4096  }
  0x28   :  { %579 = vsyncadd [#allocation10], 4294963200  ;;  %v97_v0 = vld [vmem:[#allocation9 + $0x80] sm:$0xff]  ;;  %v98_v1 = vld [vmem:[#allocation9 + $0x88] sm:$0xff]  ;;  %v69_v50 = vlaneseq  ;;  %s592_s28 = smov [#allocation11]  }
  0x29   :  { %v81_v2 = vld [vmem:[#allocation9] sm:$0xff]  ;;  %v401_v3 = vpack.c.bf16 %v98_v1, %v97_v0  ;;  %v82_v4 = vld [vmem:[#allocation9 + $0x8] sm:$0xff]  ;;  %v99_v5 = vld [vmem:[#allocation9 + $0x90] sm:$0xff]  ;;  %s314_s29 = sshll.u32 %s592_s28, 4  ;;  %s315_s29 = int_to_ptr.vmem [resolvable:$true] %s314_s29 }
  0x2a   :  { %v100_v6 = vld [vmem:[#allocation9 + $0x98] sm:$0xff]  ;;  %v403_v7 = vpack.c.bf16 %v82_v4, %v81_v2  ;;  %v83_v9 = vld [vmem:[#allocation9 + $0x10] sm:$0xff]  ;;  %v101_v11 = vld [vmem:[#allocation9 + $0xa0] sm:$0xff]  ;;  %v70_v51 = vshrl.u32 %v69_v50, 7  ;;  %vm256_vm0 = vcmp.lt.s32.totalorder %v69_v50, 256 }
  0x2b   :  { %v405_v8 = vpack.c.bf16 %v100_v6, %v99_v5  ;;  %v84_v10 = vld [vmem:[#allocation9 + $0x18] sm:$0xff]  ;;  %402 = vmatprep.subr.bf16.mxu0 %v401_v3  ;;  %v102_v12 = vld [vmem:[#allocation9 + $0xa8] sm:$0xff]  ;;  %v85_v15 = vld [vmem:[#allocation9 + $0x20] sm:$0xff] }
  0x2c   :  { %404 = vmatpush3.bf16.msra.mxu0 %v403_v7  ;;  %v407_v13 = vpack.c.bf16 %v84_v10, %v83_v9  ;;  %v409_v14 = vpack.c.bf16 %v102_v12, %v101_v11  ;;  %v86_v16 = vld [vmem:[#allocation9 + $0x28] sm:$0xff]  ;;  %v103_v17 = vld [vmem:[#allocation9 + $0xb0] sm:$0xff]  ;;  %v104_v18 = vld [vmem:[#allocation9 + $0xb8] sm:$0xff]  ;;  %v75_v52 = vsub.s32 1, %v70_v51  ;;  %v71_v54 = vsub.s32 0, %v70_v51 }
  0x2d   :  { %406 = vmatprep.subr.bf16.mxu0 %v405_v8  ;;  %v411_v19 = vpack.c.bf16 %v86_v16, %v85_v15  ;;  %v413_v20 = vpack.c.bf16 %v104_v18, %v103_v17  ;;  %v87_v21 = vld [vmem:[#allocation9 + $0x30] sm:$0xff]  ;;  %v88_v22 = vld [vmem:[#allocation9 + $0x38] sm:$0xff]  ;;  %v105_v23 = vld [vmem:[#allocation9 + $0xc0] sm:$0xff] }
  0x2e   :  { %v106_v24 = vld [vmem:[#allocation9 + $0xc8] sm:$0xff]  ;;  %v66_v25 = vld [vmem:[#allocation6 + $0x8] sm:$0xff]  ;;  %v415_v26 = vpack.c.bf16 %v88_v22, %v87_v21  ;;  %v89_v28 = vld [vmem:[#allocation9 + $0x40] sm:$0xff]  ;;  %v590_v22 = vmov 1966171168  }
  0x2f   :  { %184 = vmatprep.mubr.f32.mxu0 %v66_v25  ;;  %v417_v27 = vpack.c.bf16 %v106_v24, %v105_v23  ;;  %v90_v29 = vld [vmem:[#allocation9 + $0x48] sm:$0xff]  ;;  %v107_v30 = vld [vmem:[#allocation9 + $0xd0] sm:$0xff]  ;;  %v108_v31 = vld [vmem:[#allocation9 + $0xd8] sm:$0xff]  ;;  %v240_v23 = vunpack.c.l.s4 %v590_v22 }
  0x30   :  { %408 = vmatpush3.bf16.msra.mxu0 %v407_v13  ;;  %v419_v32 = vpack.c.bf16 %v90_v29, %v89_v28  ;;  %v421_v33 = vpack.c.bf16 %v108_v31, %v107_v30  ;;  %v91_v34 = vld [vmem:[#allocation9 + $0x50] sm:$0xff]  ;;  %v92_v35 = vld [vmem:[#allocation9 + $0x58] sm:$0xff]  ;;  %v109_v36 = vld [vmem:[#allocation9 + $0xe0] sm:$0xff] }
  0x31   :  { %410 = vmatprep.subr.bf16.mxu0 %v409_v14  ;;  %v110_v37 = vld [vmem:[#allocation9 + $0xe8] sm:$0xff]  ;;  %v423_v38 = vpack.c.bf16 %v92_v35, %v91_v34  ;;  %v93_v40 = vld [vmem:[#allocation9 + $0x60] sm:$0xff]  ;;  %v111_v42 = vld [vmem:[#allocation9 + $0xf0] sm:$0xff] }
  0x32   :  { %v425_v39 = vpack.c.bf16 %v110_v37, %v109_v36  ;;  %v94_v41 = vld [vmem:[#allocation9 + $0x68] sm:$0xff]  ;;  %v112_v43 = vld [vmem:[#allocation9 + $0xf8] sm:$0xff]  ;;  %v95_v46 = vld [vmem:[#allocation9 + $0x70] sm:$0xff] }
  0x33   :  { %v427_v44 = vpack.c.bf16 %v94_v41, %v93_v40  ;;  %v429_v45 = vpack.c.bf16 %v112_v43, %v111_v42  ;;  %v96_v47 = vld [vmem:[#allocation9 + $0x78] sm:$0xff]  ;;  %v65_v49 = vld [vmem:[#allocation6] sm:$0xff] }
  0x34   :  { %412 = vmatpush3.bf16.msra.mxu0 %v411_v19  ;;  %v431_v48 = vpack.c.bf16 %v96_v47, %v95_v46  ;;  %v67_v53 = vld [vmem:[%s729_s1] sm:$0x3]  ;;  %s591_s1 = smov [#allocation12]  }
  0x35   :  { %414 = vmatprep.subr.bf16.mxu0 %v413_v20  ;;  %v76_v55 = vrot.slane %v67_v53, %v75_v52  ;;  %v72_v56 = vrot.slane %v67_v53, %v71_v54  ;;  %s324_s27 = sshll.u32 %s591_s1, 4  ;;  %s325_s27 = int_to_ptr.vmem [resolvable:$true] %s324_s27 }
  0x36   :  { %s488_s30 = scalar_lea.vmem %s325_s27, 32  ;;  %p493_p3 = scmp.lt.s32.totalorder %s325_s27, %s325_s27 }
  0x37   :  { %v80_v57 = vmul.f32 %v76_v55, %v66_v25  ;;  %v79_v58 = vmul.f32 %v72_v56, %v65_v49  ;;  %v241_v25 = vunpack.c.0.s8 %v240_v23  ;;  %p489_p2 = scmp.ne.s32.totalorder %s325_s27, %s488_s30  ;;  %p494_p4 = scmp.lt.s32.totalorder %s488_s30, %s488_s30 }
  0x38   :  { %416 = vmatpush3.bf16.msra.mxu0 %v415_v26 }
  0x39   :  { %418 = vmatprep.subr.bf16.mxu0 %v417_v27  ;;  %v203_v59 = vmul.f32 %v80_v57, %v80_v57  ;;  %v230_v60 = vrot.slane %v80_v57, 4  ;;  %v202_v61 = vmul.f32 %v79_v58, %v79_v58  ;;  %v224_v62 = vrot.slane %v79_v58, 4  ;;  %p495_p5 = por %p494_p4, %p493_p3 }
  0x3a   :  { %v244_v26 = vsub.s32 %v241_v25, %v70_v51 }
  0x3b   :  { %v267_v63 = vrot.slane %v203_v59, 4  ;;  %v231_v0 = vadd.f32 %v230_v60, %v80_v57  ;;  %v225_v1 = vadd.f32 %v224_v62, %v79_v58  ;;  %v261_v2 = vrot.slane %v202_v61, 4  ;;  %p496_p6 = pnand %p495_p5, %p489_p2 }
  0x3c   :  { %420 = vmatpush3.bf16.msra.mxu0 %v419_v32 }
  0x3d   :  { %422 = vmatprep.subr.bf16.mxu0 %v421_v33  ;;  %v268_v3 = vadd.f32 %v267_v63, %v203_v59  ;;  %v232_v4 = vrot.slane %v231_v0, 2  ;;  %v226_v5 = vrot.slane %v225_v1, 2  ;;  %v262_v6 = vadd.f32 %v261_v2, %v202_v61 }
  0x3f   :  { %v269_v7 = vrot.slane %v268_v3, 2  ;;  %v233_v8 = vadd.f32 %v232_v4, %v231_v0  ;;  %v227_v9 = vadd.f32 %v226_v5, %v225_v1  ;;  %v263_v10 = vrot.slane %v262_v6, 2 }
  0x40   :  { %424 = vmatpush3.bf16.msra.mxu0 %v423_v38 }
  0x41   :  { %426 = vmatprep.subr.bf16.mxu0 %v425_v39  ;;  %v270_v11 = vadd.f32 %v269_v7, %v268_v3  ;;  %v234_v12 = vrot.slane %v233_v8, 1  ;;  %v228_v13 = vrot.slane %v227_v9, 1  ;;  %v264_v14 = vadd.f32 %v263_v10, %v262_v6 }
  0x43   :  { %v271_v15 = vrot.slane %v270_v11, 1  ;;  %v235_v16 = vadd.f32 %v234_v12, %v233_v8  ;;  %v229_v17 = vadd.f32 %v228_v13, %v227_v9  ;;  %v265_v18 = vrot.slane %v264_v14, 1 }
  0x44   :  { %428 = vmatpush3.bf16.msra.mxu0 %v427_v44 }
  0x45   :  { %430 = vmatprep.subr.bf16.mxu0 %v429_v45  ;;  %v272_v19 = vadd.f32 %v271_v15, %v270_v11  ;;  %v266_v20 = vadd.f32 %v265_v18, %v264_v14  ;;  %v238_v21 = vcombine.low %v229_v17, %v235_v16 }
  0x47   :  { %v275_v24 = vcombine.low %v266_v20, %v272_v19  ;;  %v245_v28 = vrot.slane %v238_v21, %v244_v26 }
  0x48   :  { %432 = vmatpush3.bf16.msra.mxu0 %v431_v48 }
  0x49   :  { %v282_v27 = vrot.slane %v275_v24, %v244_v26  ;;  %v252_v30 = vrot.slane %v245_v28, %v244_v26 }
  0x4b   :  { %185 = vmatmul.mubr.f32.vlgmr.msra.gmra.mrb[0].mxu0 %v65_v49  ;;  %v289_v29 = vrot.slane %v282_v27, %v244_v26  ;;  %258 = vst.msk [vmem:[#allocation11] sm:$0x3] %vm256_vm0, %v252_v30 }
  0x4d   :  { %291 = vst.msk [vmem:[#allocation12] sm:$0x3] %vm256_vm0, %v289_v29 }
  0x4e   :  { %499 = shalt.err (!%p496_p6)
}
  0x4f   :  { %s500_s10 = scalar_lea.hbm %s733_s5, 32 }
  0x50   :  { %p501_p7 = scmp.ne.s32.totalorder %s733_s5, %s500_s10  ;;  %p504_p8 = scmp.lt.u32.totalorder %s500_s10, %s733_s5 }
  0x52   :  { %p506_p9 = pnand %p504_p8, %p501_p7 }
  0x54   :  { %509 = shalt.err (!%p506_p9)
}
  0x55   :  { %327 = dma.vmem_to_hbm [thread:$0]  %s325_s27, 32, %s733_s5, [#allocation13]  }
  0x56   :  { %s510_s17 = scalar_lea.vmem %s315_s29, 32  ;;  %p515_p11 = scmp.lt.s32.totalorder %s315_s29, %s315_s29 }
  0x57   :  { %p511_p10 = scmp.ne.s32.totalorder %s315_s29, %s510_s17  ;;  %p516_p12 = scmp.lt.s32.totalorder %s510_s17, %s510_s17 }
  0x59   :  { %p517_p13 = por %p516_p12, %p515_p11 }
  0x5b   :  { %p518_p0 = pnand %p517_p13, %p511_p10 }
  0x5d   :  { %521 = shalt.err (!%p518_p0)
}
  0x5e   :  { %s522_s20 = scalar_lea.hbm %s732_s4, 32 }
  0x5f   :  { %p523_p1 = scmp.ne.s32.totalorder %s732_s4, %s522_s20  ;;  %p526_p2 = scmp.lt.u32.totalorder %s522_s20, %s732_s4 }
  0x61   :  { %p528_p3 = pnand %p526_p2, %p523_p1 }
  0x63   :  { %531 = shalt.err (!%p528_p3)
}
  0x64   :  { %317 = dma.vmem_to_hbm [thread:$0]  %s315_s29, 32, %s732_s4, [#allocation8]   ;;  %v365_v32 = vld [vmem:[%s731_s3] ss:$0 sm:$0xff] }
  0x65   :  { %s593_s4 = smov [#allocation14]   ;;  %s594_s1 = smov [#allocation15]  }
  0x66   :  { %s334_s26 = sshll.u32 %s593_s4, 4  ;;  %s344_s3 = sshll.u32 %s594_s1, 4  ;;  %s335_s26 = int_to_ptr.vmem [resolvable:$true] %s334_s26  ;;  %s696_s3 = int_to_ptr.vmem [resolvable:$true] %s344_s3 }
  0x67   :  { %s532_s27 = scalar_lea.vmem %s335_s26, 16  ;;  %s536_s28 = scalar_lea.vmem %s335_s26, 32 }
  0x68   :  { %p533_p4 = scmp.ne.s32.totalorder %s335_s26, %s532_s27  ;;  %p537_p5 = scmp.lt.s32.totalorder %s335_s26, %s335_s26 }
  0x69   :  { %p538_p6 = scmp.lt.s32.totalorder %s536_s28, %s532_s27 }
  0x6b   :  { %p539_p7 = por %p538_p6, %p537_p5 }
  0x6d   :  { %p540_p8 = pnand %p539_p7, %p533_p4 }
 0x11e   :  { %v398_v31 = vpop.f32.mrb[0].mxu0 }
 0x11f   :  { %v399_v33 = vpop.f32.mrb[1].mxu0 }
 0x120   :  { %v400_v34 = vadd.f32 %v399_v33, %v398_v31 }
 0x122   :  { %v187_v35 = vadd.f32 %v400_v34, %v365_v32 }
 0x124   :  { %442 = vlog2.f32 %v187_v35 }
 0x12e   :  { %v443_v36 = vpop.eup %442 }
 0x12f   :  { %v191_v37 = vmul.f32 0.6931472, %v443_v36 }
 0x131   :  { %v293_v38 = vrot.slane %v191_v37, 4  ;;  %v215_v39 = vmul.f32 %v191_v37, %v191_v37 }
 0x133   :  { %v294_v40 = vadd.f32 %v293_v38, %v191_v37  ;;  %v301_v41 = vrot.slane %v215_v39, 4 }
 0x135   :  { %v295_v42 = vrot.slane %v294_v40, 2  ;;  %v302_v43 = vadd.f32 %v301_v41, %v215_v39 }
 0x137   :  { %v296_v44 = vadd.f32 %v295_v42, %v294_v40  ;;  %v303_v45 = vrot.slane %v302_v43, 2 }
 0x139   :  { %v297_v46 = vrot.slane %v296_v44, 1  ;;  %v304_v47 = vadd.f32 %v303_v45, %v302_v43 }
 0x13b   :  { %v298_v48 = vadd.f32 %v297_v46, %v296_v44  ;;  %v305_v49 = vrot.slane %v304_v47, 1 }
 0x13d   :  { %299 = vst [vmem:[#allocation14] sm:$0x1] %v298_v48  ;;  %v306_v50 = vadd.f32 %v305_v49, %v304_v47 }
 0x13e   :  { %543 = shalt.err (!%p540_p8)
}
 0x13f   :  { %s544_s8 = scalar_lea.hbm %s734_s6, 16 }
 0x140   :  { %p545_p9 = scmp.ne.s32.totalorder %s734_s6, %s544_s8  ;;  %p548_p10 = scmp.lt.u32.totalorder %s544_s8, %s734_s6 }
 0x142   :  { %p550_p11 = pnand %p548_p10, %p545_p9 }
 0x144   :  { %553 = shalt.err (!%p550_p11)
}
 0x145   :  { %337 = dma.vmem_to_hbm [thread:$0]  %s335_s26, 16, %s734_s6, [#allocation13]   ;;  %307 = vst [vmem:[#allocation15] sm:$0x1] %v306_v50 }
 0x146   :  { %s554_s15 = scalar_lea.vmem %s696_s3, 16  ;;  %s558_s16 = scalar_lea.vmem %s696_s3, 32 }
 0x147   :  { %p555_p12 = scmp.ne.s32.totalorder %s696_s3, %s554_s15  ;;  %p559_p13 = scmp.lt.s32.totalorder %s696_s3, %s696_s3 }
 0x148   :  { %p560_p0 = scmp.lt.s32.totalorder %s558_s16, %s554_s15 }
 0x14a   :  { %p561_p1 = por %p560_p0, %p559_p13 }
 0x14c   :  { %p562_p2 = pnand %p561_p1, %p555_p12 }
 0x14e   :  { %565 = shalt.err (!%p562_p2)
}
 0x14f   :  { %s566_s19 = scalar_lea.hbm %s735_s7, 16 }
 0x150   :  { %p567_p3 = scmp.ne.s32.totalorder %s735_s7, %s566_s19  ;;  %p570_p4 = scmp.lt.u32.totalorder %s566_s19, %s735_s7 }
 0x152   :  { %p572_p5 = pnand %p570_p4, %p567_p3 }
 0x154   :  { %575 = shalt.err (!%p572_p5)
}
 0x155   :  { %347 = dma.vmem_to_hbm [thread:$0]  %s696_s3, 16, %s735_s7, [#allocation16]  }
 0x156   :  { %580 = dma.done.wait [#allocation8], 32  }
 0x157   :  { %581 = vsyncadd [#allocation8], 4294967264 }
 0x158   :  { %582 = dma.done.wait [#allocation13], 48  }
 0x159   :  { %583 = vsyncadd [#allocation13], 4294967248 }
 0x15a   :  { %584 = dma.done.wait [#allocation16], 16  }
 0x15b   :  { %585 = vsyncadd [#allocation16], 4294967280 }
 0x15c   :  { %360 = vsyncpa [#allocation7], 1 }
 0x15d   :  { %361 = vsyncpa [#allocation10], 1 }
 0x15e   :  { %362 = vsyncpa [#allocation8], 1 }
 0x15f   :  { %363 = vsyncpa [#allocation13], 1 }
 0x160   :  { %364 = vsyncpa [#allocation16], 1 }

</bundles_post_ra>
